<compile_context>
chip_gen: v6e
topology: v6e:2x2x1
jax: 0.10.0
libtpu: 0.0.40
codegen_flags: <defaults>
</compile_context>

<pallas_src>
import jax
import jax.numpy as jnp
from jax.experimental import pallas as pl
from jax.experimental.pallas import tpu as pltpu


def _round_up(x, m):
    return ((x + m - 1) // m) * m


def _default_block_b():
    # HBM-bandwidth-bound kernel: pick the batch tile per generation.
    #   v5e  (~0.82 TB/s, 16 MiB scoped default): 2048 captures most of the win.
    #   v6e/v7x: 4096 (2 input buffers ~29 MiB; fits the 48 MiB limit and
    #            v7x's 64 MiB physical VMEM with headroom — do NOT go to 8192).
    try:
        kind = jax.devices()[0].device_kind.lower()
    except Exception:
        return 2048
    if "v5" in kind:
        return 2048
    return 4096


def logreg_kernel(x_ref, w_ref, b_ref, o_ref):
    # x_ref: (TB, D) source dtype | w_ref: (1, D) f32 | b_ref: (1, 1) f32 in SMEM
    # o_ref: (TB, 1) f32
    xf = x_ref[...].astype(jnp.float32)           # in-kernel cast (VPU filler)
    wf = w_ref[...]
    # N=1 "matmul" on the VPU + XLU lane reduction: x @ W^T   -> (TB, 1)
    h = jnp.sum(xf * wf, axis=-1, keepdims=True)
    h = h + b_ref[0, 0]                           # scalar bias from SMEM
    o_ref[...] = jax.nn.sigmoid(h).astype(o_ref.dtype)   # EUP sigmoid


def logistic_regression_forward(x, w, b, *, block_b=None, vmem_limit_bytes=48 << 20):
    """Forward pass of LogisticRegression.

    x: (B, C, H, W) / (B, H, W) / (B, D), any float dtype (cast inside kernel)
    w: (out_features=1, in_features=D)  -- nn.Linear weight layout
    b: (1,) / (1, 1) / scalar            -- nn.Linear bias
    returns: (B, 1) float32
    """
    D = w.shape[-1]
    B = x.shape[0]
    x2 = x.reshape(B, D)                           # x.view(-1, flatten_dim); no dtype cast
    w2 = w.reshape(1, D).astype(jnp.float32)
    b2 = jnp.asarray(b, jnp.float32).reshape(1, 1)

    if block_b is None:
        block_b = _default_block_b()

    # Batch tile: multiple of 8 sublanes.  No padding of x for ragged B — the
    # grid is cdiv(B, tb) and the partial last block's output writes are masked
    # (and row-wise compute means garbage rows never touch valid rows).
    tb = min(block_b, _round_up(B, 8))
    if B < 2 * block_b:
        # Guarantee >=2 grid tiles when possible so v7x's second TensorCore
        # gets work on small/medium batches.
        tb = min(tb, _round_up(pl.cdiv(B, 2), 8))
    tb = max(8, _round_up(tb, 8))
    grid = (pl.cdiv(B, tb),)

    itemsize = jnp.dtype(x2.dtype).itemsize
    cost = pl.CostEstimate(
        flops=2 * B * D,
        transcendentals=B,
        bytes_accessed=B * D * itemsize + D * 4 + 4 + B * 4,
    )

    out = pl.pallas_call(
        logreg_kernel,
        out_shape=jax.ShapeDtypeStruct((B, 1), jnp.float32),
        grid=grid,
        in_specs=[
            pl.BlockSpec((tb, D), lambda i: (i, 0)),             # x: tiled over batch
            pl.BlockSpec((1, D), lambda i: (0, 0)),              # w: replicated, lane-dense
            pl.BlockSpec(memory_space=pltpu.MemorySpace.SMEM),   # b: scalar in SMEM
        ],
        out_specs=pl.BlockSpec((tb, 1), lambda i: (i, 0)),
        compiler_params=pltpu.CompilerParams(
            dimension_semantics=("parallel",),                   # shard tiles across TCs (v7x)
            vmem_limit_bytes=vmem_limit_bytes,
        ),
        cost_estimate=cost,
    )(x2, w2, b2)

    return out


if __name__ == "__main__":
    input_dim = 28
    flatten_dim = input_dim ** 2        # 784
    output_dim = 1

    key = jax.random.PRNGKey(0)
    kx, kw, kb, kx2 = jax.random.split(key, 4)

    # PyTorch nn.Linear default init: U(-1/sqrt(in), 1/sqrt(in)), native layouts.
    bound = 1.0 / (flatten_dim ** 0.5)
    w = jax.random.uniform(kw, (output_dim, flatten_dim), jnp.float32, -bound, bound)
    b = jax.random.uniform(kb, (output_dim,), jnp.float32, -bound, bound)

    # MNIST-like NCHW input, small batch.
    batch = 8
    x = jax.random.normal(kx, (batch, 1, input_dim, input_dim), jnp.float32)

    out = logistic_regression_forward(x, w, b)
    out = jax.block_until_ready(out)
    ref = jax.nn.sigmoid(x.reshape(batch, flatten_dim) @ w.T + b)
    assert out.shape == (batch, output_dim)
    assert jnp.allclose(out, ref, atol=1e-5, rtol=1e-5)

    # Ragged batch (B not a multiple of the tile) exercises the masked
    # partial-last-block path that replaced jnp.pad.
    batch_r = 13
    xr = jax.random.normal(kx2, (batch_r, 1, input_dim, input_dim), jnp.float32)
    out_r = logistic_regression_forward(xr, w, b)
    out_r = jax.block_until_ready(out_r)
    ref_r = jax.nn.sigmoid(xr.reshape(batch_r, flatten_dim) @ w.T + b)
    assert out_r.shape == (batch_r, output_dim)
    assert jnp.allclose(out_r, ref_r, atol=1e-5, rtol=1e-5)

    print("KERNEL_OK")
</pallas_src>

<mosaic_0001>
module attributes {stable_mosaic.version = 11 : i64} {
  func.func @logreg_kernel(%arg0: i32, %arg1: memref<8x784xf32, #tpu.memory_space<vmem>>, %arg2: memref<1x784xf32, #tpu.memory_space<vmem>>, %arg3: memref<1x1xf32, #tpu.memory_space<smem>>, %arg4: memref<8x1xf32, #tpu.memory_space<vmem>>) attributes {dimension_semantics = [#tpu.dimension_semantics<parallel>], iteration_bounds = array<i64: 1>, scalar_prefetch = 0 : i64, scratch_operands = 0 : i64, tpu.core_type = #tpu.core_type<tc>, window_params = [{transform_indices = @transform_0, window_bounds = array<i64: 8, 784>}, {pipeline_mode = #tpu.pipeline_mode<synchronous>, transform_indices = @transform_1, window_bounds = array<i64: 1, 784>}, {transform_indices = @transform_2, window_bounds = array<i64: 1, 1>}, {transform_indices = @transform_3, window_bounds = array<i64: 8, 1>}]} {
    %c0 = arith.constant 0 : index
    %c0_0 = arith.constant 0 : index
    %0 = vector.load %arg1[%c0, %c0_0] : memref<8x784xf32, #tpu.memory_space<vmem>>, vector<8x784xf32>
    %c0_1 = arith.constant 0 : index
    %c0_2 = arith.constant 0 : index
    %1 = vector.load %arg2[%c0_1, %c0_2] : memref<1x784xf32, #tpu.memory_space<vmem>>, vector<1x784xf32>
    %2 = vector.broadcast %1 : vector<1x784xf32> to vector<8x784xf32>
    %3 = arith.mulf %0, %2 : vector<8x784xf32>
    %cst = arith.constant dense<0.000000e+00> : vector<8xf32>
    %4 = vector.multi_reduction <add>, %3, %cst [1] : vector<8x784xf32> to vector<8xf32>
    %5 = vector.shape_cast %4 : vector<8xf32> to vector<8x1xf32>
    %c0_3 = arith.constant 0 : index
    %c0_4 = arith.constant 0 : index
    %6 = memref.load %arg3[%c0_3, %c0_4] : memref<1x1xf32, #tpu.memory_space<smem>>
    %7 = vector.broadcast %6 : f32 to vector<8x1xf32>
    %8 = arith.addf %5, %7 : vector<8x1xf32>
    %9 = arith.negf %8 : vector<8x1xf32>
    %10 = math.exp %9 : vector<8x1xf32>
    %cst_5 = arith.constant 1.000000e+00 : f32
    %11 = vector.broadcast %cst_5 : f32 to vector<8x1xf32>
    %12 = arith.addf %11, %10 : vector<8x1xf32>
    %13 = arith.divf %11, %12 : vector<8x1xf32>
    %c0_6 = arith.constant 0 : index
    %c0_7 = arith.constant 0 : index
    %14 = vector.load %arg4[%c0_6, %c0_7] : memref<8x1xf32, #tpu.memory_space<vmem>>, vector<8x1xf32>
    tpu.vector_store %arg4[%c0_6, %c0_7], %13 {strides = array<i32>} : memref<8x1xf32, #tpu.memory_space<vmem>>, vector<8x1xf32>,
    return
  }
  func.func @transform_0(%arg0: i32) -> (i32, i32) {
    %c0_i32 = arith.constant 0 : i32
    %c0_i32_0 = arith.constant 0 : i32
    return %arg0, %c0_i32 : i32, i32
  }
  func.func @transform_1(%arg0: i32) -> (i32, i32) {
    %c0_i32 = arith.constant 0 : i32
    %c0_i32_0 = arith.constant 0 : i32
    %c0_i32_1 = arith.constant 0 : i32
    return %c0_i32, %c0_i32_0 : i32, i32
  }
  func.func @transform_2(%arg0: i32) -> (i32, i32) {
    %c0_i32 = arith.constant 0 : i32
    %c0_i32_0 = arith.constant 0 : i32
    %c0_i32_1 = arith.constant 0 : i32
    return %c0_i32, %c0_i32_0 : i32, i32
  }
  func.func @transform_3(%arg0: i32) -> (i32, i32) {
    %c0_i32 = arith.constant 0 : i32
    %c0_i32_0 = arith.constant 0 : i32
    return %arg0, %c0_i32 : i32, i32
  }
}

</mosaic_0001>

<bundles_post_ra>
// kernel: tpu_custom_call.1
= control target key start
LH: loop header
LB: loop body
LE: loop exit
PB: predicated region body
PF: predicated region fallthrough
CT: control target
= control target key end

     0   :  { %9 = vsyncpa [#allocation4], 0  ;;  %s202_s0 = inlined_call_operand.hbm [shape: f32[8,784], index: 0, kind: input, shape index: {}]   ;;  %s203_s1 = inlined_call_operand.hbm [shape: f32[1,784], index: 1, kind: input, shape index: {}]   ;;  %s204_s2 = inlined_call_operand.<no memory space> [shape: f32[1,1], index: 2, kind: input, shape index: {}]   ;;  %s205_s3 = inlined_call_operand.vmem [shape: f32[8,1], index: 3, kind: output, shape index: {}]  }
   0x1   :  { %10 = vsyncpa [#allocation6], 0  ;;  %s168_s12 = smov [#allocation3]   ;;  %s169_s14 = smov [#allocation5]  }
   0x2   :  { %s17_s13 = sshll.u32 %s168_s12, 4  ;;  %s27_s15 = sshll.u32 %s169_s14, 4  ;;  %s18_s13 = int_to_ptr.vmem [resolvable:$true] %s17_s13  ;;  %s28_s15 = int_to_ptr.vmem [resolvable:$true] %s27_s15 }
   0x3   :  { %s132_s16 = scalar_lea.vmem %s18_s13, 896  ;;  %p137_p1 = scmp.lt.s32.totalorder %s18_s13, %s18_s13 }
   0x4   :  { %p133_p0 = scmp.ne.s32.totalorder %s18_s13, %s132_s16  ;;  %p138_p2 = scmp.lt.s32.totalorder %s132_s16, %s132_s16 }
   0x6   :  { %p139_p3 = por %p138_p2, %p137_p1 }
   0x8   :  { %p140_p4 = pnand %p139_p3, %p133_p0 }
   0xa   :  { %143 = shalt.err (!%p140_p4)
}
   0xb   :  { %20 = dma.hbm_to_vmem [thread:$0]  %s202_s0, 896, %s18_s13, [#allocation4]  }
   0xc   :  { %s152_s19 = scalar_lea.vmem %s28_s15, 112  ;;  %s156_s20 = scalar_lea.vmem %s28_s15, 128 }
   0xd   :  { %p153_p5 = scmp.ne.s32.totalorder %s28_s15, %s152_s19  ;;  %p157_p6 = scmp.lt.s32.totalorder %s28_s15, %s28_s15 }
   0xe   :  { %p158_p7 = scmp.lt.s32.totalorder %s156_s20, %s152_s19 }
  0x10   :  { %p159_p8 = por %p158_p7, %p157_p6 }
  0x12   :  { %p160_p9 = pnand %p159_p8, %p153_p5 }
  0x14   :  { %163 = shalt.err (!%p160_p9)
}
  0x15   :  { %30 = dma.hbm_to_vmem [thread:$0]  %s203_s1, 112, %s28_s15, [#allocation6]  }
  0x16   :  { %164 = dma.done.wait [#allocation4], 896  }
  0x17   :  { %165 = vsyncadd [#allocation4], 4294966400 }
  0x18   :  { %166 = dma.done.wait [#allocation6], 112  }
  0x19   :  { %167 = vsyncadd [#allocation6], 4294967184  ;;  %v48_v0 = vlaneseq  ;;  %v39_v6 = vld [vmem:[#allocation3] sm:$0xff]  ;;  %v40_v8 = vld [vmem:[#allocation3 + $0x8] sm:$0xff]  ;;  %vm95_vm0 = vcmask 130048   ;;  %v101_v38 = vstv %s204_s2  ;;  %vm109_vm1 = vcmask 7168  }
  0x1a   :  { %v41_v9 = vld [vmem:[#allocation3 + $0x10] sm:$0xff]  ;;  %v46_v10 = vld [vmem:[#allocation5] sm:$0x7f]  ;;  %v43_v22 = vld [vmem:[#allocation3 + $0x20] sm:$0xff] }
  0x1b   :  { %v49_v1 = vshrl.u32 %v48_v0, 7  ;;  %v42_v17 = vld [vmem:[#allocation3 + $0x18] sm:$0xff]  ;;  %v45_v24 = vld [vmem:[#allocation3 + $0x30] sm:$0xff]  ;;  %v44_v28 = vld [vmem:[#allocation3 + $0x28] sm:$0xff] }
  0x1d   :  { %v50_v2 = vsub.s32 0, %v49_v1  ;;  %v54_v3 = vsub.s32 1, %v49_v1  ;;  %v58_v4 = vsub.s32 2, %v49_v1  ;;  %v62_v5 = vsub.s32 3, %v49_v1 }
  0x1e   :  { %v66_v7 = vsub.s32 4, %v49_v1  ;;  %v70_v11 = vsub.s32 5, %v49_v1  ;;  %v74_v12 = vsub.s32 6, %v49_v1 }
  0x1f   :  { %v51_v13 = vrot.slane %v46_v10, %v50_v2  ;;  %v55_v14 = vrot.slane %v46_v10, %v54_v3  ;;  %v59_v15 = vrot.slane %v46_v10, %v58_v4  ;;  %v63_v16 = vrot.slane %v46_v10, %v62_v5 }
  0x20   :  { %v67_v18 = vrot.slane %v46_v10, %v66_v7  ;;  %v75_v23 = vrot.slane %v46_v10, %v74_v12  ;;  %v71_v25 = vrot.slane %v46_v10, %v70_v11 }
  0x21   :  { %v83_v19 = vmul.f32 %v51_v13, %v39_v6  ;;  %v84_v20 = vmul.f32 %v55_v14, %v40_v8  ;;  %v85_v21 = vmul.f32 %v59_v15, %v41_v9  ;;  %v86_v26 = vmul.f32 %v63_v16, %v42_v17 }
  0x22   :  { %v87_v29 = vmul.f32 %v67_v18, %v43_v22  ;;  %v89_v31 = vmul.f32 %v75_v23, %v45_v24  ;;  %v88_v32 = vmul.f32 %v71_v25, %v44_v28 }
  0x23   :  { %v90_v27 = vadd.f32 %v84_v20, %v83_v19 }
  0x24   :  { %v96_v35 = vsel %vm95_vm0, %v89_v31, 0.0 }
  0x25   :  { %v91_v30 = vadd.f32 %v90_v27, %v85_v21 }
  0x27   :  { %v92_v33 = vadd.f32 %v91_v30, %v86_v26 }
  0x29   :  { %v93_v34 = vadd.f32 %v92_v33, %v87_v29 }
  0x2b   :  { %v94_v36 = vadd.f32 %v93_v34, %v88_v32 }
  0x2d   :  { %v97_v37 = vadd.f32 %v96_v35, %v94_v36 }
  0x2f   :  { %98 = vadd.xlane.f32.xlu0 %v97_v37 }
  0xb8   :  { %v99_v39 = vpop.xlane.xlu0 %98 }
  0xb9   :  { %v102_v40 = vadd.f32 %v101_v38, %v99_v39 }
  0xbb   :  { %v117_v41 = vmul.f32 -1.442695, %v102_v40 }
  0xbd   :  { %120 = vpow2.f32 %v117_v41 }
  0xca   :  { %v121_v42 = vpop.eup %120 }
  0xcb   :  { %v106_v43 = vadd.f32 1.0, %v121_v42 }
  0xcd   :  { %122 = vrcp.f32 %v106_v43 }
  0xda   :  { %v123_v44 = vpop.eup %122 }
  0xdb   :  { %110 = vst.msk [vmem:[%s205_s3] sm:$0xff] %vm109_vm1, %v123_v44 }
  0xdc   :  { %115 = vsyncpa [#allocation4], 1 }
  0xdd   :  { %116 = vsyncpa [#allocation6], 1 }

</bundles_post_ra>
